<compile_context>
chip_gen: v5e
topology: v5e:2x2
jax: 0.10.0
libtpu: 0.0.40
codegen_flags: <defaults>
</compile_context>

<pallas_src>
import jax
import jax.numpy as jnp
import numpy as np
from jax.experimental import pallas as pl
from jax.experimental.pallas import tpu as pltpu

# ----------------------------- config ---------------------------------------
B = 2            # batch
N = 8            # sequence length
C = 32           # embedding dim
NUM_HEADS = 4
HEAD_DIM = C // NUM_HEADS
MLP_RATIO = 4.0
HIDDEN = int(C * MLP_RATIO)          # 128
LN_EPS = 1e-5
SCALE = HEAD_DIM ** (-0.5)
BN = B * N
NEG_INF = -1e30


def _gelu_exact(x):
    # PyTorch nn.GELU default = exact erf formulation.
    return 0.5 * x * (1.0 + jax.lax.erf(x / jnp.sqrt(2.0).astype(x.dtype)))


def _layernorm(x, w, b):
    mu = jnp.mean(x, axis=-1, keepdims=True)
    var = jnp.mean((x - mu) ** 2, axis=-1, keepdims=True)
    return (x - mu) * jax.lax.rsqrt(var + LN_EPS) * w + b


# ----------------------------- kernel ---------------------------------------
def block_kernel(
    x_ref,        # (BN, C)
    wqkv_t_ref,   # (C, 3C)     pre-transposed qkv weight
    wproj_t_ref,  # (C, C)      pre-transposed proj weight
    w1_t_ref,     # (C, HIDDEN)
    w2_t_ref,     # (HIDDEN, C)
    vecs_ref,     # (8, HIDDEN) packed small vectors (rows: ln1_w, ln1_b,
                  #             bproj, ln2_w, ln2_b, b2 in lanes [0:C]; b1 full)
    masks_ref,    # (2*H, BN, C) rows 0..H-1: per-head q mask * SCALE,
                  #              rows H..2H-1: per-head v mask (0/1)
    bias_ref,     # (BN, BN)    block-diagonal additive mask (0 / -1e30)
    out_ref,      # (BN, C)
):
    x = x_ref[...]                                              # (BN, C)

    vecs = vecs_ref[...]                                        # (8, HIDDEN)
    ln1_w = vecs[0:1, 0:C]
    ln1_b = vecs[1:2, 0:C]
    bproj = vecs[2:3, 0:C]
    ln2_w = vecs[3:4, 0:C]
    ln2_b = vecs[4:5, 0:C]
    b2 = vecs[5:6, 0:C]
    b1 = vecs[6:7, :]                                           # (1, HIDDEN)

    # ---- Attention branch ----
    xn = _layernorm(x, ln1_w, ln1_b)
    qkv = jnp.dot(xn, wqkv_t_ref[...],
                  preferred_element_type=jnp.float32)           # (BN, 3C)
    q = qkv[:, 0 * C:1 * C]                                     # (BN, C)
    k = qkv[:, 1 * C:2 * C]
    v = qkv[:, 2 * C:3 * C]

    bias = bias_ref[...]                                        # (BN, BN)

    attn_out = jnp.zeros((BN, C), jnp.float32)
    for h in range(NUM_HEADS):
        # Head selection by full-width lane mask (SCALE folded into q mask):
        # zeroed lanes contribute nothing to the contraction.
        qh = q * masks_ref[h]                                   # (BN, C)
        s = jax.lax.dot_general(qh, k, (((1,), (1,)), ((), ())),
                                preferred_element_type=jnp.float32)  # (BN, BN)
        s = s + bias
        s = s - jnp.max(s, axis=-1, keepdims=True)
        p = jnp.exp(s)
        d = jnp.sum(p, axis=-1, keepdims=True)
        r = pl.reciprocal(d, approx=True)                       # EUP vrcp
        r = r * (2.0 - d * r)                                   # one Newton step
        p = p * r
        # Masked v drops the head output into its own lanes; accumulation
        # builds the already-concatenated multi-head output.
        attn_out = attn_out + jnp.dot(p, v * masks_ref[NUM_HEADS + h],
                                      preferred_element_type=jnp.float32)

    # Single projection matmul for all heads.
    x1 = x + jnp.dot(attn_out, wproj_t_ref[...],
                     preferred_element_type=jnp.float32) + bproj

    # ---- MLP branch ----
    xn2 = _layernorm(x1, ln2_w, ln2_b)
    h1 = jnp.dot(xn2, w1_t_ref[...], preferred_element_type=jnp.float32) + b1
    h1 = _gelu_exact(h1)
    h2 = jnp.dot(h1, w2_t_ref[...], preferred_element_type=jnp.float32) + b2

    out_ref[...] = x1 + h2


# ----------------------------- wrapper ---------------------------------------
@jax.jit
def block_forward(x, params):
    (ln1_w, ln1_b, wqkv, wproj, bproj, ln2_w, ln2_b, w1, b1, w2, b2) = params

    # Pack the seven small vectors into one (8, HIDDEN) operand.
    def pad_lanes(v):
        return jnp.pad(v, (0, HIDDEN - v.shape[0]))

    vecs = jnp.stack([
        pad_lanes(ln1_w), pad_lanes(ln1_b), pad_lanes(bproj),
        pad_lanes(ln2_w), pad_lanes(ln2_b), pad_lanes(b2),
        b1, jnp.zeros((HIDDEN,), jnp.float32),
    ])                                                           # (8, HIDDEN)

    # Constant per-head lane masks, pre-broadcast to (BN, C) so no in-kernel
    # sublane broadcast is needed; SCALE is folded into the q masks.
    lane_head = np.arange(C) // HEAD_DIM
    qmasks = np.stack([(lane_head == h).astype(np.float32) * SCALE
                       for h in range(NUM_HEADS)])
    vmasks = np.stack([(lane_head == h).astype(np.float32)
                       for h in range(NUM_HEADS)])
    masks = np.ascontiguousarray(np.broadcast_to(
        np.concatenate([qmasks, vmasks], axis=0)[:, None, :],
        (2 * NUM_HEADS, BN, C))).astype(np.float32)

    # Constant block-diagonal additive softmax bias (one softmax per head
    # covers the whole batch).
    rb = np.arange(BN)[:, None] // N
    cb = np.arange(BN)[None, :] // N
    bias = np.where(rb == cb, 0.0, NEG_INF).astype(np.float32)

    args = (
        x.reshape(BN, C),
        wqkv.T,                       # (C, 3C)
        wproj.T,                      # (C, C)
        w1.T,                         # (C, HIDDEN)
        w2.T,                         # (HIDDEN, C)
        vecs,                         # (8, HIDDEN)
        jnp.asarray(masks),           # (2H, BN, C)
        jnp.asarray(bias),            # (BN, BN)
    )

    # Single invocation, everything resident in VMEM (~80 KB), no grid,
    # no pipelining machinery for constant operands.
    in_specs = [pl.BlockSpec(memory_space=pltpu.MemorySpace.VMEM)
                for _ in range(len(args))]

    out2d = pl.pallas_call(
        block_kernel,
        out_shape=jax.ShapeDtypeStruct((BN, C), jnp.float32),
        in_specs=in_specs,
        out_specs=pl.BlockSpec(memory_space=pltpu.MemorySpace.VMEM),
    )(*args)

    return out2d.reshape(B, N, C)


# ----------------------------- reference (pure JAX) ---------------------------
def block_reference(x, params):
    (ln1_w, ln1_b, wqkv, wproj, bproj, ln2_w, ln2_b, w1, b1, w2, b2) = params

    def ln(v, w, b):
        mu = jnp.mean(v, axis=-1, keepdims=True)
        var = jnp.mean((v - mu) ** 2, axis=-1, keepdims=True)
        return (v - mu) / jnp.sqrt(var + LN_EPS) * w + b

    xn = ln(x, ln1_w, ln1_b)
    qkv = xn @ wqkv.T                                       # (B, N, 3C)
    qkv = qkv.reshape(B, N, 3, NUM_HEADS, HEAD_DIM).transpose(2, 0, 3, 1, 4)
    q, k, v = qkv[0], qkv[1], qkv[2]                        # (B, H, N, hd)
    s = (q @ jnp.swapaxes(k, -2, -1)) * SCALE
    p = jax.nn.softmax(s, axis=-1)
    a = p @ v                                               # (B, H, N, hd)
    a = a.transpose(0, 2, 1, 3).reshape(B, N, C)
    a = a @ wproj.T + bproj
    x1 = x + a

    xn2 = ln(x1, ln2_w, ln2_b)
    h = _gelu_exact(xn2 @ w1.T + b1)
    y = h @ w2.T + b2
    return x1 + y


# ----------------------------- main -------------------------------------------
if __name__ == "__main__":
    key = jax.random.PRNGKey(0)
    keys = jax.random.split(key, 12)

    x = jax.random.normal(keys[0], (B, N, C), jnp.float32)

    # Deterministic synthetic parameters (shapes match the PyTorch module).
    ln1_w = 1.0 + 0.1 * jax.random.normal(keys[1], (C,), jnp.float32)
    ln1_b = 0.1 * jax.random.normal(keys[2], (C,), jnp.float32)
    wqkv  = 0.05 * jax.random.normal(keys[3], (3 * C, C), jnp.float32)  # qkv_bias=False
    wproj = 0.05 * jax.random.normal(keys[4], (C, C), jnp.float32)
    bproj = 0.05 * jax.random.normal(keys[5], (C,), jnp.float32)
    ln2_w = 1.0 + 0.1 * jax.random.normal(keys[6], (C,), jnp.float32)
    ln2_b = 0.1 * jax.random.normal(keys[7], (C,), jnp.float32)
    w1    = 0.05 * jax.random.normal(keys[8], (HIDDEN, C), jnp.float32)
    b1    = 0.05 * jax.random.normal(keys[9], (HIDDEN,), jnp.float32)
    w2    = 0.05 * jax.random.normal(keys[10], (C, HIDDEN), jnp.float32)
    b2    = 0.05 * jax.random.normal(keys[11], (C,), jnp.float32)

    params = (ln1_w, ln1_b, wqkv, wproj, bproj, ln2_w, ln2_b, w1, b1, w2, b2)

    out = block_forward(x, params)
    out = jax.block_until_ready(out)

    ref = block_reference(x, params)
    assert out.shape == (B, N, C)
    assert jnp.allclose(out, ref, rtol=1e-4, atol=1e-4), (
        f"max abs err {jnp.max(jnp.abs(out - ref))}")

    print("KERNEL_OK")
</pallas_src>

<mosaic_0001>
module attributes {stable_mosaic.version = 11 : i64} {
  func.func @block_kernel(%arg0: memref<16x32xf32, #tpu.memory_space<vmem>>, %arg1: memref<32x96xf32, #tpu.memory_space<vmem>>, %arg2: memref<32x32xf32, #tpu.memory_space<vmem>>, %arg3: memref<32x128xf32, #tpu.memory_space<vmem>>, %arg4: memref<128x32xf32, #tpu.memory_space<vmem>>, %arg5: memref<8x128xf32, #tpu.memory_space<vmem>>, %arg6: memref<8x16x32xf32, #tpu.memory_space<vmem>>, %arg7: memref<16x16xf32, #tpu.memory_space<vmem>>, %arg8: memref<16x32xf32, #tpu.memory_space<vmem>>) attributes {dimension_semantics = [], scalar_prefetch = 0 : i64, scratch_operands = 0 : i64, tpu.core_type = #tpu.core_type<tc>} {
    %c0 = arith.constant 0 : index
    %c0_0 = arith.constant 0 : index
    %0 = vector.load %arg0[%c0, %c0_0] : memref<16x32xf32, #tpu.memory_space<vmem>>, vector<16x32xf32>
    %c0_1 = arith.constant 0 : index
    %c0_2 = arith.constant 0 : index
    %1 = vector.load %arg5[%c0_1, %c0_2] : memref<8x128xf32, #tpu.memory_space<vmem>>, vector<8x128xf32>
    %2 = vector.extract_strided_slice %1 {offsets = [0, 0], sizes = [1, 32], strides = [1, 1]} : vector<8x128xf32> to vector<1x32xf32>
    %3 = vector.extract_strided_slice %1 {offsets = [1, 0], sizes = [1, 32], strides = [1, 1]} : vector<8x128xf32> to vector<1x32xf32>
    %4 = vector.extract_strided_slice %1 {offsets = [2, 0], sizes = [1, 32], strides = [1, 1]} : vector<8x128xf32> to vector<1x32xf32>
    %5 = vector.extract_strided_slice %1 {offsets = [3, 0], sizes = [1, 32], strides = [1, 1]} : vector<8x128xf32> to vector<1x32xf32>
    %6 = vector.extract_strided_slice %1 {offsets = [4, 0], sizes = [1, 32], strides = [1, 1]} : vector<8x128xf32> to vector<1x32xf32>
    %7 = vector.extract_strided_slice %1 {offsets = [5, 0], sizes = [1, 32], strides = [1, 1]} : vector<8x128xf32> to vector<1x32xf32>
    %8 = vector.extract_strided_slice %1 {offsets = [6, 0], sizes = [1, 128], strides = [1, 1]} : vector<8x128xf32> to vector<1x128xf32>
    %cst = arith.constant dense<0.000000e+00> : vector<16xf32>
    %9 = vector.multi_reduction <add>, %0, %cst [1] : vector<16x32xf32> to vector<16xf32>
    %10 = vector.shape_cast %9 : vector<16xf32> to vector<16x1xf32>
    %cst_3 = arith.constant 3.200000e+01 : f32
    %11 = vector.broadcast %cst_3 : f32 to vector<16x1xf32>
    %12 = arith.divf %10, %11 : vector<16x1xf32>
    %13 = vector.broadcast %12 : vector<16x1xf32> to vector<16x32xf32>
    %14 = arith.subf %0, %13 : vector<16x32xf32>
    %15 = arith.mulf %14, %14 : vector<16x32xf32>
    %cst_4 = arith.constant dense<0.000000e+00> : vector<16xf32>
    %16 = vector.multi_reduction <add>, %15, %cst_4 [1] : vector<16x32xf32> to vector<16xf32>
    %17 = vector.shape_cast %16 : vector<16xf32> to vector<16x1xf32>
    %cst_5 = arith.constant 3.200000e+01 : f32
    %18 = vector.broadcast %cst_5 : f32 to vector<16x1xf32>
    %19 = arith.divf %17, %18 : vector<16x1xf32>
    %20 = vector.broadcast %12 : vector<16x1xf32> to vector<16x32xf32>
    %21 = arith.subf %0, %20 : vector<16x32xf32>
    %cst_6 = arith.constant 9.99999974E-6 : f32
    %22 = vector.broadcast %cst_6 : f32 to vector<16x1xf32>
    %23 = arith.addf %19, %22 : vector<16x1xf32>
    %24 = math.rsqrt %23 : vector<16x1xf32>
    %25 = vector.broadcast %24 : vector<16x1xf32> to vector<16x32xf32>
    %26 = arith.mulf %21, %25 : vector<16x32xf32>
    %27 = vector.broadcast %2 : vector<1x32xf32> to vector<16x32xf32>
    %28 = arith.mulf %26, %27 : vector<16x32xf32>
    %29 = vector.broadcast %3 : vector<1x32xf32> to vector<16x32xf32>
    %30 = arith.addf %28, %29 : vector<16x32xf32>
    %c0_7 = arith.constant 0 : index
    %c0_8 = arith.constant 0 : index
    %31 = vector.load %arg1[%c0_7, %c0_8] : memref<32x96xf32, #tpu.memory_space<vmem>>, vector<32x96xf32>
    %cst_9 = arith.constant dense<0.000000e+00> : vector<16x96xf32>
    %32 = tpu.matmul %30, %31, %cst_9 {dimension_numbers = #tpu.dot_dimension_numbers<[1], [0], [0], [1], [0, 0, 1, 1], [], []>} : vector<16x32xf32>, vector<32x96xf32>, vector<16x96xf32> -> vector<16x96xf32>
    %33 = vector.extract_strided_slice %32 {offsets = [0, 0], sizes = [16, 32], strides = [1, 1]} : vector<16x96xf32> to vector<16x32xf32>
    %34 = vector.extract_strided_slice %32 {offsets = [0, 32], sizes = [16, 32], strides = [1, 1]} : vector<16x96xf32> to vector<16x32xf32>
    %35 = vector.extract_strided_slice %32 {offsets = [0, 64], sizes = [16, 32], strides = [1, 1]} : vector<16x96xf32> to vector<16x32xf32>
    %c0_10 = arith.constant 0 : index
    %c0_11 = arith.constant 0 : index
    %36 = vector.load %arg7[%c0_10, %c0_11] : memref<16x16xf32, #tpu.memory_space<vmem>>, vector<16x16xf32>
    %cst_12 = arith.constant 0.000000e+00 : f32
    %37 = vector.broadcast %cst_12 : f32 to vector<16x32xf32>
    %c0_13 = arith.constant 0 : index
    %c0_14 = arith.constant 0 : index
    %c0_15 = arith.constant 0 : index
    %38 = vector.load %arg6[%c0_13, %c0_14, %c0_15] : memref<8x16x32xf32, #tpu.memory_space<vmem>>, vector<1x16x32xf32>
    %39 = vector.shape_cast %38 : vector<1x16x32xf32> to vector<16x32xf32>
    %40 = arith.mulf %33, %39 : vector<16x32xf32>
    %cst_16 = arith.constant dense<0.000000e+00> : vector<16x16xf32>
    %41 = tpu.matmul %40, %34, %cst_16 {dimension_numbers = #tpu.dot_dimension_numbers<[1], [1], [0], [0], [0, 0, 1, 0], [], []>} : vector<16x32xf32>, vector<16x32xf32>, vector<16x16xf32> -> vector<16x16xf32>
    %42 = arith.addf %41, %36 : vector<16x16xf32>
    %cst_17 = arith.constant dense<0xFF800000> : vector<16xf32>
    %43 = vector.multi_reduction <maximumf>, %42, %cst_17 [1] : vector<16x16xf32> to vector<16xf32>
    %44 = vector.shape_cast %43 : vector<16xf32> to vector<16x1xf32>
    %45 = vector.broadcast %44 : vector<16x1xf32> to vector<16x16xf32>
    %46 = arith.subf %42, %45 : vector<16x16xf32>
    %47 = math.exp %46 : vector<16x16xf32>
    %cst_18 = arith.constant dense<0.000000e+00> : vector<16xf32>
    %48 = vector.multi_reduction <add>, %47, %cst_18 [1] : vector<16x16xf32> to vector<16xf32>
    %49 = vector.shape_cast %48 : vector<16xf32> to vector<16x1xf32>
    %50 = tpu.reciprocal %49 {approx = true} : vector<16x1xf32> -> vector<16x1xf32>
    %51 = arith.mulf %49, %50 : vector<16x1xf32>
    %cst_19 = arith.constant 2.000000e+00 : f32
    %52 = vector.broadcast %cst_19 : f32 to vector<16x1xf32>
    %53 = arith.subf %52, %51 : vector<16x1xf32>
    %54 = arith.mulf %50, %53 : vector<16x1xf32>
    %55 = vector.broadcast %54 : vector<16x1xf32> to vector<16x16xf32>
    %56 = arith.mulf %47, %55 : vector<16x16xf32>
    %c4 = arith.constant 4 : index
    %c0_20 = arith.constant 0 : index
    %c0_21 = arith.constant 0 : index
    %57 = vector.load %arg6[%c4, %c0_20, %c0_21] : memref<8x16x32xf32, #tpu.memory_space<vmem>>, vector<1x16x32xf32>
    %58 = vector.shape_cast %57 : vector<1x16x32xf32> to vector<16x32xf32>
    %59 = arith.mulf %35, %58 : vector<16x32xf32>
    %cst_22 = arith.constant dense<0.000000e+00> : vector<16x32xf32>
    %60 = tpu.matmul %56, %59, %cst_22 {dimension_numbers = #tpu.dot_dimension_numbers<[1], [0], [0], [1], [0, 0, 1, 1], [], []>} : vector<16x16xf32>, vector<16x32xf32>, vector<16x32xf32> -> vector<16x32xf32>
    %61 = arith.addf %37, %60 : vector<16x32xf32>
    %c1 = arith.constant 1 : index
    %c0_23 = arith.constant 0 : index
    %c0_24 = arith.constant 0 : index
    %62 = vector.load %arg6[%c1, %c0_23, %c0_24] : memref<8x16x32xf32, #tpu.memory_space<vmem>>, vector<1x16x32xf32>
    %63 = vector.shape_cast %62 : vector<1x16x32xf32> to vector<16x32xf32>
    %64 = arith.mulf %33, %63 : vector<16x32xf32>
    %cst_25 = arith.constant dense<0.000000e+00> : vector<16x16xf32>
    %65 = tpu.matmul %64, %34, %cst_25 {dimension_numbers = #tpu.dot_dimension_numbers<[1], [1], [0], [0], [0, 0, 1, 0], [], []>} : vector<16x32xf32>, vector<16x32xf32>, vector<16x16xf32> -> vector<16x16xf32>
    %66 = arith.addf %65, %36 : vector<16x16xf32>
    %cst_26 = arith.constant dense<0xFF800000> : vector<16xf32>
    %67 = vector.multi_reduction <maximumf>, %66, %cst_26 [1] : vector<16x16xf32> to vector<16xf32>
    %68 = vector.shape_cast %67 : vector<16xf32> to vector<16x1xf32>
    %69 = vector.broadcast %68 : vector<16x1xf32> to vector<16x16xf32>
    %70 = arith.subf %66, %69 : vector<16x16xf32>
    %71 = math.exp %70 : vector<16x16xf32>
    %cst_27 = arith.constant dense<0.000000e+00> : vector<16xf32>
    %72 = vector.multi_reduction <add>, %71, %cst_27 [1] : vector<16x16xf32> to vector<16xf32>
    %73 = vector.shape_cast %72 : vector<16xf32> to vector<16x1xf32>
    %74 = tpu.reciprocal %73 {approx = true} : vector<16x1xf32> -> vector<16x1xf32>
    %75 = arith.mulf %73, %74 : vector<16x1xf32>
    %cst_28 = arith.constant 2.000000e+00 : f32
    %76 = vector.broadcast %cst_28 : f32 to vector<16x1xf32>
    %77 = arith.subf %76, %75 : vector<16x1xf32>
    %78 = arith.mulf %74, %77 : vector<16x1xf32>
    %79 = vector.broadcast %78 : vector<16x1xf32> to vector<16x16xf32>
    %80 = arith.mulf %71, %79 : vector<16x16xf32>
    %c5 = arith.constant 5 : index
    %c0_29 = arith.constant 0 : index
    %c0_30 = arith.constant 0 : index
    %81 = vector.load %arg6[%c5, %c0_29, %c0_30] : memref<8x16x32xf32, #tpu.memory_space<vmem>>, vector<1x16x32xf32>
    %82 = vector.shape_cast %81 : vector<1x16x32xf32> to vector<16x32xf32>
    %83 = arith.mulf %35, %82 : vector<16x32xf32>
    %cst_31 = arith.constant dense<0.000000e+00> : vector<16x32xf32>
    %84 = tpu.matmul %80, %83, %cst_31 {dimension_numbers = #tpu.dot_dimension_numbers<[1], [0], [0], [1], [0, 0, 1, 1], [], []>} : vector<16x16xf32>, vector<16x32xf32>, vector<16x32xf32> -> vector<16x32xf32>
    %85 = arith.addf %61, %84 : vector<16x32xf32>
    %c2 = arith.constant 2 : index
    %c0_32 = arith.constant 0 : index
    %c0_33 = arith.constant 0 : index
    %86 = vector.load %arg6[%c2, %c0_32, %c0_33] : memref<8x16x32xf32, #tpu.memory_space<vmem>>, vector<1x16x32xf32>
    %87 = vector.shape_cast %86 : vector<1x16x32xf32> to vector<16x32xf32>
    %88 = arith.mulf %33, %87 : vector<16x32xf32>
    %cst_34 = arith.constant dense<0.000000e+00> : vector<16x16xf32>
    %89 = tpu.matmul %88, %34, %cst_34 {dimension_numbers = #tpu.dot_dimension_numbers<[1], [1], [0], [0], [0, 0, 1, 0], [], []>} : vector<16x32xf32>, vector<16x32xf32>, vector<16x16xf32> -> vector<16x16xf32>
    %90 = arith.addf %89, %36 : vector<16x16xf32>
    %cst_35 = arith.constant dense<0xFF800000> : vector<16xf32>
    %91 = vector.multi_reduction <maximumf>, %90, %cst_35 [1] : vector<16x16xf32> to vector<16xf32>
    %92 = vector.shape_cast %91 : vector<16xf32> to vector<16x1xf32>
    %93 = vector.broadcast %92 : vector<16x1xf32> to vector<16x16xf32>
    %94 = arith.subf %90, %93 : vector<16x16xf32>
    %95 = math.exp %94 : vector<16x16xf32>
    %cst_36 = arith.constant dense<0.000000e+00> : vector<16xf32>
    %96 = vector.multi_reduction <add>, %95, %cst_36 [1] : vector<16x16xf32> to vector<16xf32>
    %97 = vector.shape_cast %96 : vector<16xf32> to vector<16x1xf32>
    %98 = tpu.reciprocal %97 {approx = true} : vector<16x1xf32> -> vector<16x1xf32>
    %99 = arith.mulf %97, %98 : vector<16x1xf32>
    %cst_37 = arith.constant 2.000000e+00 : f32
    %100 = vector.broadcast %cst_37 : f32 to vector<16x1xf32>
    %101 = arith.subf %100, %99 : vector<16x1xf32>
    %102 = arith.mulf %98, %101 : vector<16x1xf32>
    %103 = vector.broadcast %102 : vector<16x1xf32> to vector<16x16xf32>
    %104 = arith.mulf %95, %103 : vector<16x16xf32>
    %c6 = arith.constant 6 : index
    %c0_38 = arith.constant 0 : index
    %c0_39 = arith.constant 0 : index
    %105 = vector.load %arg6[%c6, %c0_38, %c0_39] : memref<8x16x32xf32, #tpu.memory_space<vmem>>, vector<1x16x32xf32>
    %106 = vector.shape_cast %105 : vector<1x16x32xf32> to vector<16x32xf32>
    %107 = arith.mulf %35, %106 : vector<16x32xf32>
    %cst_40 = arith.constant dense<0.000000e+00> : vector<16x32xf32>
    %108 = tpu.matmul %104, %107, %cst_40 {dimension_numbers = #tpu.dot_dimension_numbers<[1], [0], [0], [1], [0, 0, 1, 1], [], []>} : vector<16x16xf32>, vector<16x32xf32>, vector<16x32xf32> -> vector<16x32xf32>
    %109 = arith.addf %85, %108 : vector<16x32xf32>
    %c3 = arith.constant 3 : index
    %c0_41 = arith.constant 0 : index
    %c0_42 = arith.constant 0 : index
    %110 = vector.load %arg6[%c3, %c0_41, %c0_42] : memref<8x16x32xf32, #tpu.memory_space<vmem>>, vector<1x16x32xf32>
    %111 = vector.shape_cast %110 : vector<1x16x32xf32> to vector<16x32xf32>
    %112 = arith.mulf %33, %111 : vector<16x32xf32>
    %cst_43 = arith.constant dense<0.000000e+00> : vector<16x16xf32>
    %113 = tpu.matmul %112, %34, %cst_43 {dimension_numbers = #tpu.dot_dimension_numbers<[1], [1], [0], [0], [0, 0, 1, 0], [], []>} : vector<16x32xf32>, vector<16x32xf32>, vector<16x16xf32> -> vector<16x16xf32>
    %114 = arith.addf %113, %36 : vector<16x16xf32>
    %cst_44 = arith.constant dense<0xFF800000> : vector<16xf32>
    %115 = vector.multi_reduction <maximumf>, %114, %cst_44 [1] : vector<16x16xf32> to vector<16xf32>
    %116 = vector.shape_cast %115 : vector<16xf32> to vector<16x1xf32>
    %117 = vector.broadcast %116 : vector<16x1xf32> to vector<16x16xf32>
    %118 = arith.subf %114, %117 : vector<16x16xf32>
    %119 = math.exp %118 : vector<16x16xf32>
    %cst_45 = arith.constant dense<0.000000e+00> : vector<16xf32>
    %120 = vector.multi_reduction <add>, %119, %cst_45 [1] : vector<16x16xf32> to vector<16xf32>
    %121 = vector.shape_cast %120 : vector<16xf32> to vector<16x1xf32>
    %122 = tpu.reciprocal %121 {approx = true} : vector<16x1xf32> -> vector<16x1xf32>
    %123 = arith.mulf %121, %122 : vector<16x1xf32>
    %cst_46 = arith.constant 2.000000e+00 : f32
    %124 = vector.broadcast %cst_46 : f32 to vector<16x1xf32>
    %125 = arith.subf %124, %123 : vector<16x1xf32>
    %126 = arith.mulf %122, %125 : vector<16x1xf32>
    %127 = vector.broadcast %126 : vector<16x1xf32> to vector<16x16xf32>
    %128 = arith.mulf %119, %127 : vector<16x16xf32>
    %c7 = arith.constant 7 : index
    %c0_47 = arith.constant 0 : index
    %c0_48 = arith.constant 0 : index
    %129 = vector.load %arg6[%c7, %c0_47, %c0_48] : memref<8x16x32xf32, #tpu.memory_space<vmem>>, vector<1x16x32xf32>
    %130 = vector.shape_cast %129 : vector<1x16x32xf32> to vector<16x32xf32>
    %131 = arith.mulf %35, %130 : vector<16x32xf32>
    %cst_49 = arith.constant dense<0.000000e+00> : vector<16x32xf32>
    %132 = tpu.matmul %128, %131, %cst_49 {dimension_numbers = #tpu.dot_dimension_numbers<[1], [0], [0], [1], [0, 0, 1, 1], [], []>} : vector<16x16xf32>, vector<16x32xf32>, vector<16x32xf32> -> vector<16x32xf32>
    %133 = arith.addf %109, %132 : vector<16x32xf32>
    %c0_50 = arith.constant 0 : index
    %c0_51 = arith.constant 0 : index
    %134 = vector.load %arg2[%c0_50, %c0_51] : memref<32x32xf32, #tpu.memory_space<vmem>>, vector<32x32xf32>
    %cst_52 = arith.constant dense<0.000000e+00> : vector<16x32xf32>
    %135 = tpu.matmul %133, %134, %cst_52 {dimension_numbers = #tpu.dot_dimension_numbers<[1], [0], [0], [1], [0, 0, 1, 1], [], []>} : vector<16x32xf32>, vector<32x32xf32>, vector<16x32xf32> -> vector<16x32xf32>
    %136 = arith.addf %0, %135 : vector<16x32xf32>
    %137 = vector.broadcast %4 : vector<1x32xf32> to vector<16x32xf32>
    %138 = arith.addf %136, %137 : vector<16x32xf32>
    %cst_53 = arith.constant dense<0.000000e+00> : vector<16xf32>
    %139 = vector.multi_reduction <add>, %138, %cst_53 [1] : vector<16x32xf32> to vector<16xf32>
    %140 = vector.shape_cast %139 : vector<16xf32> to vector<16x1xf32>
    %cst_54 = arith.constant 3.200000e+01 : f32
    %141 = vector.broadcast %cst_54 : f32 to vector<16x1xf32>
    %142 = arith.divf %140, %141 : vector<16x1xf32>
    %143 = vector.broadcast %142 : vector<16x1xf32> to vector<16x32xf32>
    %144 = arith.subf %138, %143 : vector<16x32xf32>
    %145 = arith.mulf %144, %144 : vector<16x32xf32>
    %cst_55 = arith.constant dense<0.000000e+00> : vector<16xf32>
    %146 = vector.multi_reduction <add>, %145, %cst_55 [1] : vector<16x32xf32> to vector<16xf32>
    %147 = vector.shape_cast %146 : vector<16xf32> to vector<16x1xf32>
    %cst_56 = arith.constant 3.200000e+01 : f32
    %148 = vector.broadcast %cst_56 : f32 to vector<16x1xf32>
    %149 = arith.divf %147, %148 : vector<16x1xf32>
    %150 = vector.broadcast %142 : vector<16x1xf32> to vector<16x32xf32>
    %151 = arith.subf %138, %150 : vector<16x32xf32>
    %cst_57 = arith.constant 9.99999974E-6 : f32
    %152 = vector.broadcast %cst_57 : f32 to vector<16x1xf32>
    %153 = arith.addf %149, %152 : vector<16x1xf32>
    %154 = math.rsqrt %153 : vector<16x1xf32>
    %155 = vector.broadcast %154 : vector<16x1xf32> to vector<16x32xf32>
    %156 = arith.mulf %151, %155 : vector<16x32xf32>
    %157 = vector.broadcast %5 : vector<1x32xf32> to vector<16x32xf32>
    %158 = arith.mulf %156, %157 : vector<16x32xf32>
    %159 = vector.broadcast %6 : vector<1x32xf32> to vector<16x32xf32>
    %160 = arith.addf %158, %159 : vector<16x32xf32>
    %c0_58 = arith.constant 0 : index
    %c0_59 = arith.constant 0 : index
    %161 = vector.load %arg3[%c0_58, %c0_59] : memref<32x128xf32, #tpu.memory_space<vmem>>, vector<32x128xf32>
    %cst_60 = arith.constant dense<0.000000e+00> : vector<16x128xf32>
    %162 = tpu.matmul %160, %161, %cst_60 {dimension_numbers = #tpu.dot_dimension_numbers<[1], [0], [0], [1], [0, 0, 1, 1], [], []>} : vector<16x32xf32>, vector<32x128xf32>, vector<16x128xf32> -> vector<16x128xf32>
    %163 = vector.broadcast %8 : vector<1x128xf32> to vector<16x128xf32>
    %164 = arith.addf %162, %163 : vector<16x128xf32>
    %cst_61 = arith.constant 5.000000e-01 : f32
    %165 = vector.broadcast %cst_61 : f32 to vector<16x128xf32>
    %166 = arith.mulf %165, %164 : vector<16x128xf32>
    %cst_62 = arith.constant 2.000000e+00 : f32
    %167 = math.sqrt %cst_62 : f32
    %168 = vector.broadcast %167 : f32 to vector<16x128xf32>
    %169 = arith.divf %164, %168 : vector<16x128xf32>
    %170 = math.erf %169 : vector<16x128xf32>
    %cst_63 = arith.constant 1.000000e+00 : f32
    %171 = vector.broadcast %cst_63 : f32 to vector<16x128xf32>
    %172 = arith.addf %171, %170 : vector<16x128xf32>
    %173 = arith.mulf %166, %172 : vector<16x128xf32>
    %c0_64 = arith.constant 0 : index
    %c0_65 = arith.constant 0 : index
    %174 = vector.load %arg4[%c0_64, %c0_65] : memref<128x32xf32, #tpu.memory_space<vmem>>, vector<128x32xf32>
    %cst_66 = arith.constant dense<0.000000e+00> : vector<16x32xf32>
    %175 = tpu.matmul %173, %174, %cst_66 {dimension_numbers = #tpu.dot_dimension_numbers<[1], [0], [0], [1], [0, 0, 1, 1], [], []>} : vector<16x128xf32>, vector<128x32xf32>, vector<16x32xf32> -> vector<16x32xf32>
    %176 = vector.broadcast %7 : vector<1x32xf32> to vector<16x32xf32>
    %177 = arith.addf %175, %176 : vector<16x32xf32>
    %178 = arith.addf %138, %177 : vector<16x32xf32>
    %c0_67 = arith.constant 0 : index
    %c0_68 = arith.constant 0 : index
    %179 = vector.load %arg8[%c0_67, %c0_68] : memref<16x32xf32, #tpu.memory_space<vmem>>, vector<16x32xf32>
    tpu.vector_store %arg8[%c0_67, %c0_68], %178 {strides = array<i32>} : memref<16x32xf32, #tpu.memory_space<vmem>>, vector<16x32xf32>,
    return
  }
}

</mosaic_0001>

<bundles_post_ra>
// kernel: block_forward.1
= control target key start
LH: loop header
LB: loop body
LE: loop exit
PB: predicated region body
PF: predicated region fallthrough
CT: control target
= control target key end

     0   :  { %13 = vsyncpa [#allocation3], 0  ;;  %s1506_s0 = inlined_call_operand.hbm [shape: f32[16,32], index: 0, kind: input, shape index: {}]   ;;  %s1507_s1 = inlined_call_operand.vmem [shape: f32[32,96], index: 1, kind: input, shape index: {}]   ;;  %s1508_s2 = inlined_call_operand.vmem [shape: f32[32,32], index: 2, kind: input, shape index: {}]   ;;  %s1509_s3 = inlined_call_operand.vmem [shape: f32[32,128], index: 3, kind: input, shape index: {}]   ;;  %s1510_s4 = inlined_call_operand.vmem [shape: f32[128,32], index: 4, kind: input, shape index: {}]   ;;  %s1511_s5 = inlined_call_operand.vmem [shape: f32[8,128], index: 5, kind: input, shape index: {}]   ;;  %s1512_s6 = inlined_call_operand.vmem [shape: f32[8,16,32], index: 6, kind: input, shape index: {}]   ;;  %s1513_s7 = inlined_call_operand.hbm [shape: f32[16,16], index: 7, kind: input, shape index: {}]   ;;  %s1514_s8 = inlined_call_operand.hbm [shape: f32[16,32], index: 8, kind: output, shape index: {}]  }
   0x1   :  { %14 = vsyncpa [#allocation6], 0 }
   0x2   :  { %15 = vsyncpa [#allocation4], 0  ;;  %s20_s29 = sshll.u32 %s1506_s0, 4  ;;  %s1104_s30 = smov [#allocation2]   ;;  %s21_s29 = int_to_ptr.hbm [resolvable:$true] %s20_s29 }
   0x3   :  { %s22_s9 = sshll.u32 %s1104_s30, 4  ;;  %s45_s12 = sshll.u32 %s1513_s7, 4  ;;  %s23_s9 = int_to_ptr.vmem [resolvable:$true] %s22_s9  ;;  %s46_s12 = int_to_ptr.hbm [resolvable:$true] %s45_s12 }
   0x4   :  { %s1105_s13 = smov 128   ;;  %s1106_s14 = smov 8  }
   0x5   :  { %28 = dma.hbm_to_vmem [thread:$0]  %s21_s29, 256, %s23_s9, [#allocation3], %s1105_s13, %s1105_s13, %s1106_s14  }
   0x6   :  { %s1107_s15 = smov [#allocation5]  }
   0x7   :  { %s47_s16 = sshll.u32 %s1107_s15, 4  ;;  %s48_s16 = int_to_ptr.vmem [resolvable:$true] %s47_s16 }
   0x8   :  { %53 = dma.hbm_to_vmem [thread:$0]  %s46_s12, 256, %s48_s16, [#allocation6], %s1105_s13, %s1105_s13, %s1106_s14  }
   0x9   :  { %1098 = dma.done.wait [#allocation3], 256  }
   0xa   :  { %1099 = vsyncadd [#allocation3], 4294967040 }
   0xb   :  { %1100 = dma.done.wait [#allocation6], 256  }
   0xc   :  { %1101 = vsyncadd [#allocation6], 4294967040  ;;  %vm65_vm0 = vcmask 261120   ;;  %v1170_v0 = vld [vmem:[#allocation2] sm:$0xff]  ;;  %v1174_v2 = vld [vmem:[#allocation2 + $0x8] sm:$0xff]  ;;  %v1108_v4 = vmov 32.0  }
   0xd   :  { %v66_v1 = vsel %vm65_vm0, %v1170_v0, 0.0  ;;  %v69_v3 = vsel %vm65_vm0, %v1174_v2, 0.0  ;;  %978 = vrcp.f32 %v1108_v4  ;;  %v126_v21 = vld [vmem:[%s1507_s1 + $0x18] sm:$0xff]  ;;  %v125_v22 = vld [vmem:[%s1507_s1 + $0x10] sm:$0xff]  ;;  %s1109_s21 = smov 64   ;;  %v124_v24 = vld [vmem:[%s1507_s1 + $0x8] sm:$0xff] }
   0xe   :  { %67 = vadd.xlane.f32.xlu0 %v66_v1  ;;  %145 = vmatpush.msra.mxu0 %v126_v21  ;;  %v916_v23 = vld [vmem:[%s1512_s6 + $0x58] sm:$0xff]  ;;  %v123_v25 = vld [vmem:[%s1507_s1] sm:$0xff]  ;;  %v915_v30 = vld [vmem:[%s1512_s6 + $0x50] sm:$0xff]  ;;  %vm201_vm8 = vcmask 130048   ;;  %s887_s10 = sshll.u32 %s1514_s8, 4  ;;  %s888_s10 = int_to_ptr.hbm [resolvable:$true] %s887_s10 }
   0xf   :  { %v907_v26 = vld [vmem:[%s1512_s6 + $0x40] sm:$0xff]  ;;  %v937_v31 = vld [vmem:[%s1512_s6 + $0x70] sm:$0xff]  ;;  %v938_v36 = vld [vmem:[%s1512_s6 + $0x78] sm:$0xff] }
  0x10   :  { %146 = vmatpush.msra.mxu0 %v125_v22  ;;  %v1223_v41 = vld [vmem:[%s1511_s5] sm:$0xff]  ;;  %s1110_s5 = smov 96   ;;  %v908_v61 = vld [vmem:[%s1512_s6 + $0x48] sm:$0xff]  ;;  %v909_v1 = vld [vmem:[%s1512_s6 + $0x10] sm:$0xff] }
  0x11   :  { %v117_v45 = vperm.slane %v1223_v41, 0  ;;  %v120_v49 = vperm.slane %v1223_v41, 1  ;;  %v158_v63 = vld [vmem:[%s1512_s6] sm:$0xff]  ;;  %v910_v4 = vld [vmem:[%s1512_s6 + $0x18] sm:$0xff] }
  0x12   :  { %147 = vmatpush.msra.mxu0 %v124_v24 }
  0x13   :  { %v979_v5 = vpop.eup %978 }
  0x14   :  { %v73_v6 = vmul.f32 32.0, %v979_v5  ;;  %vm77_vm1 = vweird.f32 %v979_v5  ;;  %148 = vmatpush.msra.mxu0 %v123_v25 }
  0x16   :  { %70 = vadd.xlane.f32.xlu0 %v69_v3  ;;  %v74_v7 = vsub.f32 1.0, %v73_v6 }
  0x18   :  { %v75_v8 = vmul.f32 %v979_v5, %v74_v7 }
  0x1a   :  { %v76_v9 = vadd.f32 %v979_v5, %v75_v8 }
  0x1c   :  { %v1178_v10 = vsel %vm77_vm1, %v979_v5, %v76_v9  ;;  %v921_v5 = vld [vmem:[%s1512_s6 + $0x20] sm:$0xff] }
  0x2a   :  { %310 = vrot.lane.b32.xlu0 %v915_v30, %s1109_s21 }
  0x32   :  { %575 = vrot.lane.b32.xlu0 %v938_v36, %s1109_s21 }
  0x81   :  { %v68_v11 = vpop.xlane.xlu0 %67 }
  0x82   :  { %v79_v12 = vmul.f32 %v1178_v10, %v68_v11  ;;  %v159_v11 = vld [vmem:[%s1512_s6 + $0x8] sm:$0xff] }
  0x84   :  { %v81_v13 = vsub.f32 %v1170_v0, %v79_v12  ;;  %v931_v12 = vld [vmem:[%s1512_s6 + $0x30] sm:$0xff] }
  0x86   :  { %v83_v14 = vmul.f32 %v81_v13, %v81_v13 }
  0x88   :  { %v85_v15 = vsel %vm65_vm0, %v83_v14, 0.0 }
  0x89   :  { %86 = vadd.xlane.f32.xlu1 %v85_v15  ;;  %v71_v16 = vpop.xlane.xlu0 %70 }
  0x8a   :  { %v80_v17 = vmul.f32 %v1178_v10, %v71_v16 }
  0x8c   :  { %v82_v18 = vsub.f32 %v1174_v2, %v80_v17  ;;  %v932_v17 = vld [vmem:[%s1512_s6 + $0x38] sm:$0xff] }
  0x8e   :  { %v84_v19 = vmul.f32 %v82_v18, %v82_v18 }
  0x90   :  { %v88_v20 = vsel %vm65_vm0, %v84_v19, 0.0  ;;  %v156_v19 = vld [vmem:[#allocation5] sm:$0xff] }
  0x91   :  { %89 = vadd.xlane.f32.xlu1 %v88_v20 }
  0xaa   :  { %312 = vrot.lane.b32.xlu1 %v916_v23, %s1109_s21 }
  0xb2   :  { %235 = vrot.lane.b32.xlu1 %v907_v26, %s1109_s21  ;;  %v157_v26 = vld [vmem:[#allocation5 + $0x8] sm:$0xff] }
  0xba   :  { %573 = vrot.lane.b32.xlu1 %v937_v31, %s1109_s21 }
  0xfc   :  { %v87_v27 = vpop.xlane.xlu1 %86 }
  0xfd   :  { %v91_v28 = vmul.f32 %v87_v27, %v1178_v10 }
  0xff   :  { %v93_v29 = vadd.f32 1e-05, %v91_v28 }
 0x101   :  { %980 = vrsqrt.f32 %v93_v29  ;;  %vm101_vm3 = vweird.f32 %v93_v29 }
 0x104   :  { %v90_v32 = vpop.xlane.xlu1 %89 }
 0x105   :  { %v92_v33 = vmul.f32 %v90_v32, %v1178_v10 }
 0x107   :  { %v981_v34 = vpop.eup %980  ;;  %v94_v35 = vadd.f32 1e-05, %v92_v33 }
 0x108   :  { %v96_v37 = vmul.f32 %v981_v34, %v93_v29  ;;  %vm102_vm2 = vweird.f32 %v981_v34 }
 0x109   :  { %982 = vrsqrt.f32 %v94_v35  ;;  %vm103_vm4 = vmor %vm101_vm3, %vm102_vm2  ;;  %vm111_vm6 = vweird.f32 %v94_v35 }
 0x10a   :  { %v97_v38 = vmul.f32 %v981_v34, %v96_v37 }
 0x10c   :  { %v98_v39 = vmul.f32 0.5, %v97_v38 }
 0x10e   :  { %v99_v40 = vsub.f32 1.5, %v98_v39 }
 0x10f   :  { %v983_v42 = vpop.eup %982 }
 0x110   :  { %v100_v43 = vmul.f32 %v981_v34, %v99_v40  ;;  %v106_v44 = vmul.f32 %v983_v42, %v94_v35  ;;  %vm112_vm5 = vweird.f32 %v983_v42  ;;  %v311_v40 = vpop.permute.xlu0 %310 }
 0x111   :  { %vm113_vm7 = vmor %vm111_vm6, %vm112_vm5 }
 0x112   :  { %v104_v46 = vsel %vm103_vm4, %v981_v34, %v100_v43  ;;  %v107_v47 = vmul.f32 %v983_v42, %v106_v44 }
 0x113   :  { %v115_v48 = vmul.f32 %v104_v46, %v81_v13  ;;  %v922_v13 = vld [vmem:[%s1512_s6 + $0x28] sm:$0xff] }
 0x114   :  { %v108_v50 = vmul.f32 0.5, %v107_v47 }
 0x115   :  { %v118_v51 = vmul.f32 %v117_v45, %v115_v48  ;;  %v928_v48 = vld [vmem:[%s1512_s6 + $0x68] sm:$0xff] }
 0x116   :  { %v109_v52 = vsub.f32 1.5, %v108_v50 }
 0x117   :  { %v121_v53 = vadd.f32 %v120_v49, %v118_v51 }
 0x118   :  { %v110_v54 = vmul.f32 %v983_v42, %v109_v52 }
 0x119   :  { %901 = vmatmul.msk.f32.vlgmr.msra.gmra.mxu0 %vm65_vm0, %v121_v53 }
 0x11a   :  { %v114_v55 = vsel %vm113_vm7, %v983_v42, %v110_v54 }
 0x11b   :  { %v116_v56 = vmul.f32 %v114_v55, %v82_v18  ;;  %v1314_v55 = vpop.permute.xlu0 %575 }
 0x11c   :  { %v313_v38 = vpop.permute.xlu1 %312 }
 0x11d   :  { %v119_v57 = vmul.f32 %v117_v45, %v116_v56 }
 0x11f   :  { %v122_v58 = vadd.f32 %v120_v49, %v119_v57  ;;  %v927_v49 = vld [vmem:[%s1512_s6 + $0x60] sm:$0xff] }
 0x121   :  { %902 = vmatmul.msk.f32.gmra.mxu0 %vm65_vm0, %v122_v58 }
 0x124   :  { %v236_v53 = vpop.permute.xlu1 %235 }
 0x12c   :  { %v1316_v56 = vpop.permute.xlu1 %573 }
 0x196   :  { %v1229_v59 = vpop.f32.mrf.mxu0 }
 0x197   :  { %v160_v6 = vmul.f32 %v158_v63, %v1229_v59  ;;  %v246_v7 = vmul.f32 %v909_v1, %v1229_v59  ;;  %v395_v9 = vmul.f32 %v921_v5, %v1229_v59  ;;  %v509_v15 = vmul.f32 %v931_v12, %v1229_v59 }
 0x198   :  { %v316_v44 = vmul.f32 %v311_v40, %v1229_v59 }
 0x19e   :  { %v1231_v60 = vpop.f32.mrf.mxu0 }
 0x19f   :  { %166 = vrot.lane.b32.xlu2 %v1231_v60, %s1110_s5  ;;  %v247_v8 = vmul.f32 %v910_v4, %v1231_v60  ;;  %v161_v14 = vmul.f32 %v159_v11, %v1231_v60  ;;  %v396_v16 = vmul.f32 %v922_v13, %v1231_v60  ;;  %v510_v18 = vmul.f32 %v932_v17, %v1231_v60 }
 0x1a0   :  { %v317_v43 = vmul.f32 %v313_v38, %v1231_v60 }
 0x1a2   :  { %v958_v46 = vpack.i.bf16 %v316_v44, %v317_v43 }
 0x1a7   :  { %164 = vrot.lane.b32.xlu2 %v1229_v59, %s1110_s5 }
 0x1af   :  { %237 = vrot.lane.b32.xlu2 %v908_v61, %s1109_s21 }
 0x1f9   :  { %v167_v62 = vpop.permute.xlu2 %166 }
 0x1fa   :  { %903 = vmatpush.xpose.msk.msra.mxu1 %vm65_vm0, %v167_v62  ;;  %911 = vmatpush.xpose.msk.msra.mxu2 %vm65_vm0, %v167_v62 }
 0x1fb   :  { %947 = vmatpush.xpose.msk.msra.mxu3 %vm65_vm0, %v167_v62  ;;  %923 = vmatpush.xpose.msk.msrb.mxu0 %vm65_vm0, %v167_v62 }
 0x201   :  { %v165_v3 = vpop.permute.xlu2 %164 }
 0x202   :  { %904 = vmatpush.xpose.msk.msra.mxu1 %vm65_vm0, %v165_v3  ;;  %912 = vmatpush.xpose.msk.msra.mxu2 %vm65_vm0, %v165_v3 }
 0x203   :  { %948 = vmatpush.xpose.msk.msra.mxu3 %vm65_vm0, %v165_v3  ;;  %924 = vmatpush.xpose.msk.msrb.mxu0 %vm65_vm0, %v165_v3 }
 0x205   :  { %905 = vmatmul.msk.f32.vlgmr.msra.gmra.mxu1 %vm65_vm0, %v160_v6  ;;  %913 = vmatmul.msk.f32.vlgmr.msra.gmra.mxu2 %vm65_vm0, %v246_v7 }
 0x206   :  { %933 = vmatpush.xpose.msk.msrb.mxu2 %vm65_vm0, %v167_v62  ;;  %914 = vmatmul.msk.f32.vlgmr.msra.gmra.mxu3 %vm65_vm0, %v247_v8 }
 0x207   :  { %925 = vmatmul.msk.f32.vlgmr.msrb.gmra.mxu0 %vm65_vm0, %v395_v9 }
 0x209   :  { %v238_v54 = vpop.permute.xlu2 %237 }
 0x20a   :  { %934 = vmatpush.xpose.msk.msrb.mxu2 %vm65_vm0, %v165_v3 }
 0x20d   :  { %906 = vmatmul.msk.f32.gmra.mxu1 %vm65_vm0, %v161_v14  ;;  %935 = vmatmul.msk.f32.vlgmr.msrb.gmra.mxu2 %vm65_vm0, %v509_v15 }
 0x20f   :  { %926 = vmatmul.msk.f32.gmra.mxu0 %vm65_vm0, %v396_v16 }
 0x215   :  { %936 = vmatmul.msk.f32.gmra.mxu2 %vm65_vm0, %v510_v18 }
 0x282   :  { %v195_v20 = vpop.f32.mrf.mxu1 }
 0x283   :  { %v196_v21 = vadd.f32 %v195_v20, %v156_v19 }
 0x284   :  { %v420_v22 = vpop.f32.mrf.mxu0 }
 0x285   :  { %v421_v23 = vadd.f32 %v420_v22, %v156_v19  ;;  %v202_v24 = vsel %vm201_vm8, %v196_v21, -inf }
 0x286   :  { %203 = vmax.xlane.f32.xlu2 %v202_v24 }
 0x287   :  { %v426_v25 = vsel %vm201_vm8, %v421_v23, -inf }
 0x288   :  { %427 = vmax.xlane.f32.xlu0 %v426_v25  ;;  %v271_v27 = vpop.f32.mrf.mxu2 }
 0x289   :  { %v274_v28 = vpop.f32.mrf.mxu3  ;;  %v272_v29 = vadd.f32 %v271_v27, %v156_v19 }
 0x28a   :  { %v275_v30 = vadd.f32 %v274_v28, %v157_v26  ;;  %v198_v33 = vpop.f32.mrf.mxu1 }
 0x28b   :  { %v277_v32 = vsel %vm201_vm8, %v272_v29, -inf  ;;  %v199_v36 = vadd.f32 %v198_v33, %v157_v26 }
 0x28c   :  { %v280_v31 = vsel %vm201_vm8, %v275_v30, -inf  ;;  %v423_v42 = vpop.f32.mrf.mxu0 }
 0x28d   :  { %281 = vmax.xlane.f32.xlu1 %v280_v31  ;;  %v205_v39 = vsel %vm201_vm8, %v199_v36, -inf  ;;  %v424_v45 = vadd.f32 %v423_v42, %v157_v26  ;;  %v242_v31 = vmul.f32 %v238_v54, %v1231_v60 }
 0x28f   :  { %v429_v47 = vsel %vm201_vm8, %v424_v45, -inf }
 0x290   :  { %278 = vmax.xlane.f32.xlu0 %v277_v32  ;;  %v534_v34 = vpop.f32.mrf.mxu2  ;;  %v241_v32 = vmul.f32 %v236_v53, %v1229_v59 }
 0x291   :  { %v1293_v35 = vadd.f32 %v534_v34, %v156_v19 }
 0x292   :  { %v963_v33 = vpack.i.bf16 %v241_v32, %v242_v31 }
 0x293   :  { %v540_v37 = vsel %vm201_vm8, %v1293_v35, -inf }
 0x295   :  { %541 = vmax.xlane.f32.xlu1 %v540_v37 }
 0x298   :  { %206 = vmax.xlane.f32.xlu0 %v205_v39  ;;  %v537_v50 = vpop.f32.mrf.mxu2 }
 0x299   :  { %v1310_v51 = vadd.f32 %v537_v50, %v157_v26 }
 0x29b   :  { %v543_v52 = vsel %vm201_vm8, %v1310_v51, -inf }
 0x29e   :  { %959 = vrot.lane.b32.xlu2 %v958_v46, %s1109_s21 }
 0x2a0   :  { %430 = vmax.xlane.f32.xlu0 %v429_v47 }
 0x2ae   :  { %461 = vrot.lane.b32.xlu1 %v928_v48, %s1109_s21 }
 0x2b4   :  { %459 = vrot.lane.b32.xlu0 %v927_v49, %s1109_s21 }
 0x2c7   :  { %544 = vmax.xlane.f32.xlu2 %v543_v52 }
 0x2f9   :  { %v204_v57 = vpop.xlane.xlu2 %203 }
 0x2fa   :  { %v208_v58 = vsub.f32 %v196_v21, %v204_v57 }
 0x2fb   :  { %v428_v61 = vpop.xlane.xlu0 %427 }
 0x2fc   :  { %v210_v62 = vmul.f32 1.442695, %v208_v58  ;;  %v432_v63 = vsub.f32 %v421_v23, %v428_v61 }
 0x2fe   :  { %984 = vpow2.f32 %v210_v62  ;;  %v434_v1 = vmul.f32 1.442695, %v432_v63 }
 0x300   :  { %v282_v3 = vpop.xlane.xlu1 %281  ;;  %986 = vpow2.f32 %v434_v1 }
 0x301   :  { %v284_v4 = vsub.f32 %v275_v30, %v282_v3  ;;  %v960_v5 = vpop.permute.xlu2 %959 }
 0x302   :  { %v961_v7 = vunpack.i.l.bf16 %v960_v5  ;;  %v962_v12 = vunpack.i.h.bf16 %v960_v5 }
 0x303   :  { %v279_v6 = vpop.xlane.xlu0 %278  ;;  %v287_v8 = vmul.f32 1.442695, %v284_v4 }
 0x304   :  { %v283_v9 = vsub.f32 %v272_v29, %v279_v6  ;;  %v1318_v11 = vpop.eup %984  ;;  %346 = vmatpush.msrb.mxu3 %v961_v7 }
 0x305   :  { %988 = vpow2.f32 %v287_v8  ;;  %v214_v14 = vsel %vm201_vm8, %v1318_v11, 0.0 }
 0x306   :  { %v285_v13 = vmul.f32 1.442695, %v283_v9  ;;  %215 = vadd.xlane.f32.xlu1 %v214_v14  ;;  %347 = vmatpush.msrb.mxu3 %v962_v12  ;;  %v1322_v15 = vpop.eup %986 }
 0x307   :  { %v438_v22 = vsel %vm201_vm8, %v1322_v15, 0.0 }
 0x308   :  { %990 = vpow2.f32 %v285_v13  ;;  %v542_v34 = vpop.xlane.xlu1 %541 }
 0x309   :  { %v546_v44 = vsub.f32 %v1293_v35, %v542_v34  ;;  %v579_v35 = vmul.f32 %v1316_v56, %v1229_v59 }
 0x30b   :  { %v207_v16 = vpop.xlane.xlu0 %206  ;;  %v1324_v17 = vpop.eup %988  ;;  %v548_v46 = vmul.f32 1.442695, %v546_v44 }
 0x30c   :  { %v209_v18 = vsub.f32 %v199_v36, %v207_v16  ;;  %v292_v19 = vsel %vm201_vm8, %v1324_v17, 0.0 }
 0x30d   :  { %293 = vadd.xlane.f32.xlu2 %v292_v19 }
 0x30e   :  { %v1328_v20 = vpop.eup %990  ;;  %v212_v21 = vmul.f32 1.442695, %v209_v18  ;;  %439 = vadd.xlane.f32.xlu1 %v438_v22 }
 0x30f   :  { %v289_v23 = vsel %vm201_vm8, %v1328_v20, 0.0 }
 0x310   :  { %992 = vpow2.f32 %v212_v21  ;;  %290 = vadd.xlane.f32.xlu0 %v289_v23 }
 0x313   :  { %v431_v24 = vpop.xlane.xlu0 %430 }
 0x314   :  { %v433_v25 = vsub.f32 %v424_v45, %v431_v24 }
 0x316   :  { %v1334_v26 = vpop.eup %992  ;;  %v436_v27 = vmul.f32 1.442695, %v433_v25 }
 0x317   :  { %v217_v28 = vsel %vm201_vm8, %v1334_v26, 0.0 }
 0x318   :  { %994 = vpow2.f32 %v436_v27  ;;  %218 = vadd.xlane.f32.xlu0 %v217_v28 }
 0x31e   :  { %v1338_v29 = vpop.eup %994 }
 0x31f   :  { %v441_v30 = vsel %vm201_vm8, %v1338_v29, 0.0 }
 0x320   :  { %442 = vadd.xlane.f32.xlu1 %v441_v30  ;;  %v462_v37 = vpop.permute.xlu1 %461 }
 0x321   :  { %v466_v39 = vmul.f32 %v462_v37, %v1231_v60 }
 0x325   :  { %964 = vrot.lane.b32.xlu2 %v963_v33, %s1109_s21 }
 0x326   :  { %v460_v36 = vpop.permute.xlu0 %459 }
 0x327   :  { %v465_v38 = vmul.f32 %v460_v36, %v1229_v59 }
 0x329   :  { %v973_v40 = vpack.i.bf16 %v465_v38, %v466_v39 }
 0x339   :  { %974 = vrot.lane.b32.xlu1 %v973_v40, %s1109_s21 }
 0x33a   :  { %v545_v42 = vpop.xlane.xlu2 %544 }
 0x33b   :  { %v547_v43 = vsub.f32 %v1310_v51, %v545_v42  ;;  %v580_v51 = vmul.f32 %v1314_v55, %v1231_v60 }
 0x33d   :  { %v550_v45 = vmul.f32 1.442695, %v547_v43  ;;  %v968_v52 = vpack.i.bf16 %v579_v35, %v580_v51 }
 0x33f   :  { %996 = vpow2.f32 %v550_v45 }
 0x340   :  { %998 = vpow2.f32 %v548_v46 }
 0x345   :  { %v1350_v47 = vpop.eup %996 }
 0x346   :  { %v555_v48 = vsel %vm201_vm8, %v1350_v47, 0.0  ;;  %v1354_v49 = vpop.eup %998 }
 0x347   :  { %556 = vadd.xlane.f32.xlu0 %v555_v48  ;;  %v552_v50 = vsel %vm201_vm8, %v1354_v49, 0.0 }
 0x34e   :  { %553 = vadd.xlane.f32.xlu2 %v552_v50 }
 0x35b   :  { %969 = vrot.lane.b32.xlu0 %v968_v52, %s1109_s21  ;;  %v623_v52 = vld [vmem:[%s1508_s2 + $0x18] sm:$0xff] }
 0x35c   :  { %642 = vmatpush.msra.mxu0 %v623_v52 }
 0x379   :  { %v216_v58 = vpop.xlane.xlu1 %215 }
 0x380   :  { %v294_v53 = vpop.xlane.xlu2 %293 }
 0x381   :  { %1000 = vrcp.f32 %v294_v53  ;;  %v440_v9 = vpop.xlane.xlu1 %439 }
 0x383   :  { %v291_v54 = vpop.xlane.xlu0 %290 }
 0x384   :  { %1002 = vrcp.f32 %v291_v54 }
 0x385   :  { %1004 = vrcp.f32 %v216_v58 }
 0x387   :  { %v1001_v57 = vpop.eup %1000 }
 0x388   :  { %v965_v61 = vpop.permute.xlu2 %964  ;;  %v298_v60 = vmul.f32 %v1001_v57, %v294_v53  ;;  %v622_v53 = vld [vmem:[%s1508_s2 + $0x10] sm:$0xff] }
 0x389   :  { %v966_v63 = vunpack.i.l.bf16 %v965_v61  ;;  %v967_v3 = vunpack.i.h.bf16 %v965_v61  ;;  %643 = vmatpush.msra.mxu0 %v622_v53 }
 0x38a   :  { %v1003_v62 = vpop.eup %1002  ;;  %v300_v56 = vsub.f32 2.0, %v298_v60 }
 0x38b   :  { %v297_v1 = vmul.f32 %v1003_v62, %v291_v54  ;;  %383 = vmatpush.msra.mxu3 %v966_v63  ;;  %v219_v5 = vpop.xlane.xlu0 %218  ;;  %v1005_v6 = vpop.eup %1004 }
 0x38c   :  { %1006 = vrcp.f32 %v219_v5  ;;  %v222_v7 = vmul.f32 %v1005_v6, %v216_v58  ;;  %v302_v8 = vmul.f32 %v1001_v57, %v300_v56 }
 0x38d   :  { %v299_v55 = vsub.f32 2.0, %v297_v1  ;;  %384 = vmatpush.msra.mxu3 %v967_v3  ;;  %1008 = vrcp.f32 %v440_v9 }
 0x38e   :  { %v224_v12 = vsub.f32 2.0, %v222_v7  ;;  %v304_v13 = vmul.f32 %v1324_v17, %v302_v8 }
 0x38f   :  { %v301_v59 = vmul.f32 %v1003_v62, %v299_v55 }
 0x390   :  { %v226_v16 = vmul.f32 %v1005_v6, %v224_v12  ;;  %v655_v6 = vperm.slane %v1223_v41, 2 }
 0x391   :  { %v303_v4 = vmul.f32 %v1328_v20, %v301_v59 }
 0x392   :  { %v1007_v14 = vpop.eup %1006  ;;  %v228_v20 = vmul.f32 %v1318_v11, %v226_v16 }
 0x393   :  { %917 = vmatmul.msk.f32.vlgmr.msrb.gmra.mxu3 %vm201_vm8, %v303_v4  ;;  %v223_v18 = vmul.f32 %v1007_v14, %v219_v5  ;;  %v443_v19 = vpop.xlane.xlu1 %442  ;;  %v1009_v21 = vpop.eup %1008 }
 0x394   :  { %1010 = vrcp.f32 %v443_v19  ;;  %v446_v23 = vmul.f32 %v1009_v21, %v440_v9 }
 0x395   :  { %v225_v22 = vsub.f32 2.0, %v223_v18 }
 0x396   :  { %v448_v25 = vsub.f32 2.0, %v446_v23 }
 0x397   :  { %v227_v24 = vmul.f32 %v1007_v14, %v225_v22 }
 0x398   :  { %v450_v28 = vmul.f32 %v1009_v21, %v448_v25 }
 0x399   :  { %v229_v17 = vmul.f32 %v1334_v26, %v227_v24 }
 0x39a   :  { %v1011_v27 = vpop.eup %1010  ;;  %v452_v11 = vmul.f32 %v1322_v15, %v450_v28  ;;  %v710_v28 = vld [vmem:[%s1509_s3 + $0x10] sm:$0xff] }
 0x39b   :  { %918 = vmatmul.msk.f32.gmra.mxu3 %vm201_vm8, %v304_v13  ;;  %v447_v30 = vmul.f32 %v1011_v27, %v443_v19 }
 0x39d   :  { %v449_v34 = vsub.f32 2.0, %v447_v30  ;;  %v709_v30 = vld [vmem:[%s1509_s3 + $0x8] sm:$0xff] }
 0x39f   :  { %v451_v36 = vmul.f32 %v1011_v27, %v449_v34 }
 0x3a1   :  { %v453_v37 = vmul.f32 %v1338_v29, %v451_v36 }
 0x3a3   :  { %919 = vmatmul.msk.f32.vlgmr.msra.gmra.mxu3 %vm201_vm8, %v228_v20 }
 0x3ab   :  { %v975_v31 = vpop.permute.xlu1 %974  ;;  %920 = vmatmul.msk.f32.gmra.mxu3 %vm201_vm8, %v229_v17  ;;  %v711_v17 = vld [vmem:[%s1509_s3 + $0x18] sm:$0xff] }
 0x3ac   :  { %v976_v32 = vunpack.i.l.bf16 %v975_v31  ;;  %v977_v33 = vunpack.i.h.bf16 %v975_v31  ;;  %v708_v31 = vld [vmem:[%s1509_s3] sm:$0xff] }
 0x3ae   :  { %495 = vmatpush.msrb.mxu1 %v976_v32 }
 0x3b0   :  { %496 = vmatpush.msrb.mxu1 %v977_v33 }
 0x3b1   :  { %929 = vmatmul.msk.f32.vlgmr.msrb.gmra.mxu1 %vm201_vm8, %v452_v11 }
 0x3b2   :  { %731 = vmatpush.msra.mxu1 %v711_v17 }
 0x3b4   :  { %732 = vmatpush.msra.mxu1 %v710_v28  ;;  %v842_v28 = vld [vmem:[%s1510_s4 + $0x28] sm:$0xff] }
 0x3b6   :  { %733 = vmatpush.msra.mxu1 %v709_v30 }
 0x3b8   :  { %734 = vmatpush.msra.mxu1 %v708_v31 }
 0x3b9   :  { %930 = vmatmul.msk.f32.gmra.mxu1 %vm201_vm8, %v453_v37 }
 0x3ba   :  { %v557_v26 = vpop.xlane.xlu0 %556 }
 0x3c1   :  { %v554_v38 = vpop.xlane.xlu2 %553 }
 0x3c2   :  { %1012 = vrcp.f32 %v554_v38 }
 0x3c3   :  { %1014 = vrcp.f32 %v557_v26 }
 0x3c8   :  { %v1013_v39 = vpop.eup %1012 }
 0x3c9   :  { %v560_v40 = vmul.f32 %v1013_v39, %v554_v38  ;;  %v1015_v42 = vpop.eup %1014 }
 0x3ca   :  { %v561_v44 = vmul.f32 %v1015_v42, %v557_v26 }
 0x3cb   :  { %v562_v43 = vsub.f32 2.0, %v560_v40 }
 0x3cc   :  { %v563_v50 = vsub.f32 2.0, %v561_v44 }
 0x3cd   :  { %v564_v45 = vmul.f32 %v1013_v39, %v562_v43  ;;  %v970_v15 = vpop.permute.xlu0 %969 }
 0x3ce   :  { %v971_v46 = vunpack.i.l.bf16 %v970_v15  ;;  %v972_v48 = vunpack.i.h.bf16 %v970_v15  ;;  %v565_v29 = vmul.f32 %v1015_v42, %v563_v50  ;;  %v702_v15 = vperm.slane %v1223_v41, 3 }
 0x3cf   :  { %v566_v51 = vmul.f32 %v1354_v49, %v564_v45  ;;  %v621_v49 = vld [vmem:[%s1508_s2 + $0x8] sm:$0xff] }
 0x3d0   :  { %609 = vmatpush.msrb.mxu3 %v971_v46  ;;  %v567_v35 = vmul.f32 %v1350_v47, %v565_v29  ;;  %644 = vmatpush.msra.mxu0 %v621_v49  ;;  %v620_v47 = vld [vmem:[%s1508_s2] sm:$0xff] }
 0x3d2   :  { %610 = vmatpush.msrb.mxu3 %v972_v48  ;;  %645 = vmatpush.msra.mxu0 %v620_v47 }
 0x3d3   :  { %939 = vmatmul.msk.f32.vlgmr.msrb.gmra.mxu3 %vm201_vm8, %v566_v51 }
 0x3db   :  { %940 = vmatmul.msk.f32.gmra.mxu3 %vm201_vm8, %v567_v35 }
 0x416   :  { %v349_v54 = vpop.f32.mrf.mxu3 }
 0x41e   :  { %v352_v57 = vpop.f32.mrf.mxu3 }
 0x426   :  { %v386_v58 = vpop.f32.mrf.mxu3 }
 0x427   :  { %v387_v63 = vadd.f32 %v386_v58, %v349_v54  ;;  %v1111_v58 = vmov 1.4142135  }
 0x42e   :  { %v389_v61 = vpop.f32.mrf.mxu3  ;;  %v498_v62 = vpop.f32.mrf.mxu1 }
 0x42f   :  { %v504_v1 = vadd.f32 %v498_v62, %v387_v63  ;;  %v390_v59 = vadd.f32 %v389_v61, %v352_v57 }
 0x436   :  { %v501_v55 = vpop.f32.mrf.mxu1 }
 0x437   :  { %v505_v56 = vadd.f32 %v501_v55, %v390_v59  ;;  %v850_v55 = vld [vmem:[%s1510_s4 + $0x68] sm:$0xff] }
 0x456   :  { %v612_v3 = vpop.f32.mrf.mxu3 }
 0x457   :  { %v618_v60 = vadd.f32 %v612_v3, %v504_v1  ;;  %v852_v1 = vld [vmem:[%s1510_s4 + $0x78] sm:$0xff] }
 0x458   :  { %854 = vmatpush.msra.mxu2 %v852_v1 }
 0x459   :  { %941 = vmatmul.msk.f32.vlgmr.msra.gmra.mxu0 %vm65_vm0, %v618_v60  ;;  %v851_v60 = vld [vmem:[%s1510_s4 + $0x70] sm:$0xff] }
 0x45a   :  { %855 = vmatpush.msra.mxu2 %v851_v60 }
 0x45c   :  { %856 = vmatpush.msra.mxu2 %v850_v55 }
 0x45e   :  { %v615_v4 = vpop.f32.mrf.mxu3 }
 0x45f   :  { %v619_v5 = vadd.f32 %v615_v4, %v505_v56  ;;  %v712_v56 = vperm.slane %v1223_v41, 6  ;;  %v849_v4 = vld [vmem:[%s1510_s4 + $0x60] sm:$0xff] }
 0x460   :  { %857 = vmatpush.msra.mxu2 %v849_v4 }
 0x461   :  { %942 = vmatmul.msk.f32.gmra.mxu0 %vm65_vm0, %v619_v5  ;;  %v848_v5 = vld [vmem:[%s1510_s4 + $0x58] sm:$0xff] }
 0x462   :  { %858 = vmatpush.msra.mxu2 %v848_v5 }
 0x4d6   :  { %v647_v7 = vpop.f32.mrf.mxu0 }
 0x4d7   :  { %v653_v8 = vadd.f32 %v647_v7, %v1170_v0 }
 0x4d9   :  { %v1395_v9 = vadd.f32 %v655_v6, %v653_v8 }
 0x4db   :  { %v658_v12 = vsel %vm65_vm0, %v1395_v9, 0.0 }
 0x4dc   :  { %659 = vadd.xlane.f32.xlu2 %v658_v12  ;;  %v847_v12 = vld [vmem:[%s1510_s4 + $0x50] sm:$0xff] }
 0x4dd   :  { %859 = vmatpush.msra.mxu2 %v847_v12 }
 0x4de   :  { %v650_v13 = vpop.f32.mrf.mxu0 }
 0x4df   :  { %v654_v14 = vadd.f32 %v650_v13, %v1174_v2 }
 0x4e1   :  { %v1400_v16 = vadd.f32 %v655_v6, %v654_v14  ;;  %v846_v14 = vld [vmem:[%s1510_s4 + $0x48] sm:$0xff] }
 0x4e2   :  { %860 = vmatpush.msra.mxu2 %v846_v14 }
 0x4e3   :  { %v661_v18 = vsel %vm65_vm0, %v1400_v16, 0.0 }
 0x4e4   :  { %662 = vadd.xlane.f32.xlu0 %v661_v18 }
 0x54f   :  { %v660_v19 = vpop.xlane.xlu2 %659 }
 0x550   :  { %v664_v21 = vmul.f32 %v660_v19, %v1178_v10  ;;  %v845_v19 = vld [vmem:[%s1510_s4 + $0x40] sm:$0xff] }
 0x551   :  { %861 = vmatpush.msra.mxu2 %v845_v19 }
 0x552   :  { %v666_v0 = vsub.f32 %v1395_v9, %v664_v21 }
 0x554   :  { %v668_v20 = vmul.f32 %v666_v0, %v666_v0 }
 0x556   :  { %v670_v22 = vsel %vm65_vm0, %v668_v20, 0.0 }
 0x557   :  { %671 = vadd.xlane.f32.xlu2 %v670_v22  ;;  %v663_v23 = vpop.xlane.xlu0 %662 }
 0x558   :  { %v665_v24 = vmul.f32 %v663_v23, %v1178_v10 }
 0x55a   :  { %v667_v2 = vsub.f32 %v1400_v16, %v665_v24 }
 0x55c   :  { %v669_v25 = vmul.f32 %v667_v2, %v667_v2 }
 0x55e   :  { %v673_v27 = vsel %vm65_vm0, %v669_v25, 0.0 }
 0x55f   :  { %674 = vadd.xlane.f32.xlu1 %v673_v27 }
 0x5ca   :  { %v672_v32 = vpop.xlane.xlu2 %671 }
 0x5cb   :  { %v676_v33 = vmul.f32 %v672_v32, %v1178_v10 }
 0x5cd   :  { %v678_v11 = vadd.f32 1e-05, %v676_v33  ;;  %v841_v33 = vld [vmem:[%s1510_s4 + $0x20] sm:$0xff] }
 0x5cf   :  { %1016 = vrsqrt.f32 %v678_v11  ;;  %vm686_vm10 = vweird.f32 %v678_v11 }
 0x5d2   :  { %v675_v34 = vpop.xlane.xlu1 %674 }
 0x5d3   :  { %v677_v36 = vmul.f32 %v675_v34, %v1178_v10  ;;  %v705_v10 = vperm.slane %v1223_v41, 4 }
 0x5d5   :  { %v1017_v37 = vpop.eup %1016  ;;  %v679_v26 = vadd.f32 1e-05, %v677_v36  ;;  %v840_v36 = vld [vmem:[%s1510_s4 + $0x18] sm:$0xff] }
 0x5d6   :  { %v681_v38 = vmul.f32 %v1017_v37, %v678_v11  ;;  %vm687_vm9 = vweird.f32 %v1017_v37 }
 0x5d7   :  { %1018 = vrsqrt.f32 %v679_v26  ;;  %vm688_vm11 = vmor %vm686_vm10, %vm687_vm9  ;;  %vm696_vm13 = vweird.f32 %v679_v26 }
 0x5d8   :  { %v682_v39 = vmul.f32 %v1017_v37, %v681_v38  ;;  %1020 = vrcp.f32 %v1111_v58 }
 0x5da   :  { %v683_v40 = vmul.f32 0.5, %v682_v39  ;;  %v839_v39 = vld [vmem:[%s1510_s4 + $0x10] sm:$0xff] }
 0x5dc   :  { %v684_v42 = vsub.f32 1.5, %v683_v40 }
 0x5dd   :  { %v1019_v43 = vpop.eup %1018 }
 0x5de   :  { %v685_v44 = vmul.f32 %v1017_v37, %v684_v42  ;;  %v691_v45 = vmul.f32 %v1019_v43, %v679_v26  ;;  %vm697_vm12 = vweird.f32 %v1019_v43  ;;  %v1021_v61 = vpop.eup %1020 }
 0x5df   :  { %vm698_vm14 = vmor %vm696_vm13, %vm697_vm12  ;;  %v745_v62 = vmul.f32 1.4142135, %v1021_v61  ;;  %vm749_vm15 = vweird.f32 %v1021_v61 }
 0x5e0   :  { %v689_v46 = vsel %vm688_vm11, %v1017_v37, %v685_v44  ;;  %v692_v48 = vmul.f32 %v1019_v43, %v691_v45  ;;  %v838_v45 = vld [vmem:[%s1510_s4 + $0x8] sm:$0xff] }
 0x5e1   :  { %v700_v50 = vmul.f32 %v689_v46, %v666_v0  ;;  %v746_v63 = vsub.f32 1.0, %v745_v62  ;;  %v844_v0 = vld [vmem:[%s1510_s4 + $0x38] sm:$0xff] }
 0x5e2   :  { %v693_v51 = vmul.f32 0.5, %v692_v48  ;;  %862 = vmatpush.msra.mxu2 %v844_v0 }
 0x5e3   :  { %v703_v29 = vmul.f32 %v702_v15, %v700_v50  ;;  %v747_v3 = vmul.f32 %v1021_v61, %v746_v63 }
 0x5e4   :  { %v694_v35 = vsub.f32 1.5, %v693_v51 }
 0x5e5   :  { %v706_v52 = vadd.f32 %v705_v10, %v703_v29  ;;  %v748_v59 = vadd.f32 %v1021_v61, %v747_v3 }
 0x5e6   :  { %v695_v53 = vmul.f32 %v1019_v43, %v694_v35 }
 0x5e7   :  { %943 = vmatmul.msk.f32.vlgmr.msra.gmra.mxu1 %vm65_vm0, %v706_v52  ;;  %v750_v7 = vsel %vm749_vm15, %v1021_v61, %v748_v59 }
 0x5e8   :  { %v699_v54 = vsel %vm698_vm14, %v1019_v43, %v695_v53 }
 0x5e9   :  { %v701_v49 = vmul.f32 %v699_v54, %v667_v2  ;;  %v843_v2 = vld [vmem:[%s1510_s4 + $0x30] sm:$0xff] }
 0x5ea   :  { %863 = vmatpush.msra.mxu2 %v843_v2 }
 0x5eb   :  { %v704_v47 = vmul.f32 %v702_v15, %v701_v49  ;;  %v837_v15 = vld [vmem:[%s1510_s4] sm:$0xff]  ;;  %s1112_s4 = smov [#allocation7]  }
 0x5ec   :  { %864 = vmatpush.msra.mxu2 %v842_v28  ;;  %s885_s30 = sshll.u32 %s1112_s4, 4  ;;  %s886_s30 = int_to_ptr.vmem [resolvable:$true] %s885_s30 }
 0x5ed   :  { %v707_v57 = vadd.f32 %v705_v10, %v704_v47 }
 0x5ee   :  { %865 = vmatpush.msra.mxu2 %v841_v33 }
 0x5ef   :  { %944 = vmatmul.msk.f32.gmra.mxu1 %vm65_vm0, %v707_v57 }
 0x5f0   :  { %866 = vmatpush.msra.mxu2 %v840_v36 }
 0x5f2   :  { %867 = vmatpush.msra.mxu2 %v839_v39 }
 0x5f4   :  { %868 = vmatpush.msra.mxu2 %v838_v45 }
 0x5f6   :  { %869 = vmatpush.msra.mxu2 %v837_v15 }
 0x664   :  { %v736_v6 = vpop.f32.mrf.mxu1 }
 0x665   :  { %v1444_v8 = vadd.f32 %v736_v6, %v712_v56 }
 0x667   :  { %v1450_v13 = vmul.f32 %v750_v7, %v1444_v8  ;;  %v742_v36 = vmul.f32 0.5, %v1444_v8  ;;  %v853_v8 = vperm.slane %v1223_v41, 5 }
 0x669   :  { %v753_v18 = vmul.f32 %v1450_v13, %v1450_v13 }
 0x66b   :  { %v754_v21 = vmin.f32 %v753_v18, 16.0 }
 0x66c   :  { %v739_v20 = vpop.f32.mrf.mxu1 }
 0x66d   :  { %v755_v22 = vmul.f32 2.1237322e-06, %v754_v21  ;;  %v766_v23 = vmul.f32 3.8918573e-05, %v754_v21  ;;  %v1463_v24 = vadd.f32 %v739_v20, %v712_v56 }
 0x66f   :  { %v756_v25 = vadd.f32 0.00028619796, %v755_v22  ;;  %v767_v27 = vadd.f32 0.001143296, %v766_v23  ;;  %v1469_v17 = vmul.f32 %v750_v7, %v1463_v24 }
 0x671   :  { %v757_v30 = vmul.f32 %v756_v25, %v754_v21  ;;  %v768_v31 = vmul.f32 %v767_v27, %v754_v21  ;;  %v793_v32 = vmul.f32 %v1469_v17, %v1469_v17 }
 0x673   :  { %v769_v11 = vadd.f32 0.014752088, %v768_v31  ;;  %v794_v34 = vmin.f32 %v793_v32, 16.0  ;;  %v758_v37 = vadd.f32 0.0036580483, %v757_v30 }
 0x675   :  { %v770_v26 = vmul.f32 %v769_v11, %v754_v21  ;;  %v795_v38 = vmul.f32 2.1237322e-06, %v794_v34  ;;  %v806_v40 = vmul.f32 3.8918573e-05, %v794_v34  ;;  %v759_v44 = vmul.f32 %v758_v37, %v754_v21 }
 0x677   :  { %v771_v42 = vadd.f32 0.112945676, %v770_v26  ;;  %v796_v43 = vadd.f32 0.00028619796, %v795_v38  ;;  %v807_v46 = vadd.f32 0.001143296, %v806_v40 }
 0x678   :  { %v760_v29 = vadd.f32 0.05243302, %v759_v44  ;;  %v743_v44 = vmul.f32 0.5, %v1463_v24 }
 0x679   :  { %v772_v48 = vmul.f32 %v771_v42, %v754_v21  ;;  %v797_v50 = vmul.f32 %v796_v43, %v794_v34  ;;  %v808_v10 = vmul.f32 %v807_v46, %v794_v34 }
 0x67a   :  { %v761_v47 = vmul.f32 %v760_v29, %v754_v21 }
 0x67b   :  { %v773_v51 = vadd.f32 0.4994258, %v772_v48  ;;  %v809_v35 = vadd.f32 0.014752088, %v808_v10  ;;  %v798_v53 = vadd.f32 0.0036580483, %v797_v50 }
 0x67c   :  { %v762_v62 = vadd.f32 0.18741608, %v761_v47 }
 0x67d   :  { %v774_v52 = vmul.f32 %v773_v51, %v754_v21  ;;  %v810_v54 = vmul.f32 %v809_v35, %v794_v34  ;;  %v799_v58 = vmul.f32 %v798_v53, %v794_v34 }
 0x67e   :  { %v763_v55 = vmul.f32 %v762_v62, %v754_v21 }
 0x67f   :  { %v775_v49 = vadd.f32 1.0, %v774_v52  ;;  %v811_v57 = vadd.f32 0.112945676, %v810_v54  ;;  %v800_v1 = vadd.f32 0.05243302, %v799_v58 }
 0x680   :  { %v764_v7 = vadd.f32 1.1283791, %v763_v55 }
 0x681   :  { %1022 = vrcp.f32 %v775_v49  ;;  %v812_v61 = vmul.f32 %v811_v57, %v794_v34  ;;  %v801_v4 = vmul.f32 %v800_v1, %v794_v34  ;;  %v787_v6 = vand.u32 2147483648, %v775_v49 }
 0x682   :  { %v785_v14 = vand.u32 2147483647, %v775_v49  ;;  %vm781_vm2 = vweird.f32 %v775_v49  ;;  %v765_v22 = vmul.f32 %v764_v7, %v1450_v13 }
 0x683   :  { %v813_v63 = vadd.f32 0.4994258, %v812_v61  ;;  %v802_v18 = vadd.f32 0.18741608, %v801_v4  ;;  %v788_v0 = vor.u32 1.1754944e-38, %v787_v6 }
 0x684   :  { %vm786_vm4 = vcmp.eq.f32.partialorder %v785_v14, 8.507059e+37 }
 0x685   :  { %v814_v3 = vmul.f32 %v813_v63, %v794_v34  ;;  %v803_v2 = vmul.f32 %v802_v18, %v794_v34 }
 0x687   :  { %v1023_v60 = vpop.eup %1022  ;;  %v815_v56 = vadd.f32 1.0, %v814_v3  ;;  %v804_v32 = vadd.f32 1.1283791, %v803_v2 }
 0x688   :  { %v777_v59 = vmul.f32 %v1023_v60, %v775_v49  ;;  %vm782_vm1 = vweird.f32 %v1023_v60 }
 0x689   :  { %1024 = vrcp.f32 %v815_v56  ;;  %vm783_vm3 = vmor %vm781_vm2, %vm782_vm1  ;;  %v827_v31 = vand.u32 2147483648, %v815_v56  ;;  %v825_v11 = vand.u32 2147483647, %v815_v56  ;;  %vm821_vm6 = vweird.f32 %v815_v56 }
 0x68a   :  { %v778_v5 = vsub.f32 1.0, %v777_v59  ;;  %v805_v39 = vmul.f32 %v804_v32, %v1469_v17 }
 0x68b   :  { %v828_v13 = vor.u32 1.1754944e-38, %v827_v31  ;;  %vm826_vm8 = vcmp.eq.f32.partialorder %v825_v11, 8.507059e+37 }
 0x68c   :  { %v779_v12 = vmul.f32 %v1023_v60, %v778_v5 }
 0x68e   :  { %v780_v19 = vadd.f32 %v1023_v60, %v779_v12 }
 0x68f   :  { %v1025_v20 = vpop.eup %1024 }
 0x690   :  { %v784_v23 = vsel %vm783_vm3, %v1023_v60, %v780_v19  ;;  %v817_v25 = vmul.f32 %v1025_v20, %v815_v56  ;;  %vm822_vm5 = vweird.f32 %v1025_v20 }
 0x691   :  { %v789_v21 = vsel %vm786_vm4, %v788_v0, %v784_v23  ;;  %vm823_vm7 = vmor %vm821_vm6, %vm822_vm5 }
 0x692   :  { %v790_v27 = vmul.f32 %v789_v21, %v765_v22  ;;  %v818_v28 = vsub.f32 1.0, %v817_v25 }
 0x694   :  { %v945_v30 = vclamps-f32 %v790_v27, 1.0  ;;  %v819_v33 = vmul.f32 %v1025_v20, %v818_v28 }
 0x696   :  { %v833_v37 = vadd.f32 1.0, %v945_v30  ;;  %v820_v26 = vadd.f32 %v1025_v20, %v819_v33 }
 0x698   :  { %v835_v38 = vmul.f32 %v833_v37, %v742_v36  ;;  %v824_v34 = vsel %vm823_vm7, %v1025_v20, %v820_v26 }
 0x699   :  { %v829_v40 = vsel %vm826_vm8, %v828_v13, %v824_v34 }
 0x69a   :  { %870 = vmatmul.f32.vlgmr.msra.gmra.mxu2 %v835_v38  ;;  %v830_v42 = vmul.f32 %v829_v40, %v805_v39 }
 0x69c   :  { %v946_v43 = vclamps-f32 %v830_v42, 1.0 }
 0x69e   :  { %v834_v45 = vadd.f32 1.0, %v946_v43 }
 0x6a0   :  { %v836_v15 = vmul.f32 %v834_v45, %v743_v44 }
 0x6a2   :  { %873 = vmatmul.f32.gmra.mxu2 %v836_v15 }
 0x71d   :  { %v871_v46 = vpop.f32.mrf.mxu2 }
 0x71e   :  { %v872_v48 = vadd.f32 %v871_v46, %v853_v8 }
 0x720   :  { %v877_v50 = vadd.f32 %v872_v48, %v1395_v9 }
 0x722   :  { %879 = vst.msk [vmem:[#allocation7] sm:$0xff] %vm65_vm0, %v877_v50 }
 0x725   :  { %v874_v17 = vpop.f32.mrf.mxu2 }
 0x726   :  { %v875_v10 = vadd.f32 %v874_v17, %v853_v8 }
 0x728   :  { %v878_v24 = vadd.f32 %v875_v10, %v1400_v16 }
 0x72a   :  { %880 = vst.msk [vmem:[#allocation7 + $0x8] sm:$0xff] %vm65_vm0, %v878_v24 }
 0x72b   :  { %893 = dma.vmem_to_hbm [thread:$0]  %s886_s30, 256, %s888_s10, [#allocation4], %s1105_s13, %s1105_s13, %s1106_s14  }
 0x72c   :  { %1102 = dma.done.wait [#allocation4], 256  }
 0x72d   :  { %1103 = vsyncadd [#allocation4], 4294967040 }
 0x72e   :  { %898 = vsyncpa [#allocation3], 1 }
 0x72f   :  { %899 = vsyncpa [#allocation6], 1 }
 0x730   :  { %900 = vsyncpa [#allocation4], 1 }

</bundles_post_ra>
